<compile_context>
chip_gen: v5e
topology: v5e:2x2
jax: 0.10.0
libtpu: 0.0.40
codegen_flags: <defaults>
</compile_context>

<pallas_src>
import jax
import jax.numpy as jnp
from jax.experimental import pallas as pl
from jax.experimental.pallas import tpu as pltpu


# Sublane tile cap. VMEM per (TB, 2) f32 block is lane-padded to TB*128*4 B,
# so TB=1024 -> 0.5 MiB per buffer; with double buffering + output this stays
# far below the scoped-VMEM defaults on v5e (16 MiB), v6e (32 MiB), v7x (32 MiB).
_MAX_TILE = 1024


def _round_up(n, m):
    return (n + m - 1) // m * m


def _choose_tile(batch):
    """Pick (tile, padded_batch): tile is a multiple of 8 sublanes that divides
    the padded batch, capped at _MAX_TILE."""
    bp = _round_up(max(batch, 1), 8)
    if bp <= _MAX_TILE:
        return bp, bp
    bp = _round_up(batch, _MAX_TILE)
    return _MAX_TILE, bp


# ----------------------------------------------------------------------------
# Kernel 1: Linear(2, 1) forward, natural layout, gridded over batch.
#   params_ref: SMEM (3,)        = [w0, w1, b]
#   x_ref:      VMEM (TB, 2)     batch tile on sublanes
#   out_ref:    VMEM (TB, 1)
# ----------------------------------------------------------------------------
def _linear_kernel(params_ref, x_ref, out_ref):
    w0 = params_ref[0]
    w1 = params_ref[1]
    b = params_ref[2]
    # Two VPU FMAs per tile; no MXU (K=2, N=1 would be <1% MXU utilization).
    out_ref[...] = x_ref[:, 0:1] * w0 + x_ref[:, 1:2] * w1 + b


# ----------------------------------------------------------------------------
# Kernel 2 ('loss' mode): streaming reduction using linearity of the loss.
#   params_ref: SMEM (4,)        = [w0, w1, b, n_true]
#   x_ref:      VMEM (TB, 2)
#   labels_ref: VMEM (TB, 1)
#   loss_ref:   SMEM (1, 1)      scalar output (resident across the grid)
#   acc_ref:    SMEM (3,) scratch = [sum(x0), sum(x1), sum(labels)]
# ----------------------------------------------------------------------------
def _loss_kernel(params_ref, x_ref, labels_ref, loss_ref, acc_ref):
    i = pl.program_id(0)

    @pl.when(i == 0)
    def _():
        acc_ref[0] = jnp.float32(0.0)
        acc_ref[1] = jnp.float32(0.0)
        acc_ref[2] = jnp.float32(0.0)

    # Per-tile partial sums (zero-padded rows contribute nothing).
    acc_ref[0] = acc_ref[0] + jnp.sum(x_ref[:, 0:1])
    acc_ref[1] = acc_ref[1] + jnp.sum(x_ref[:, 1:2])
    acc_ref[2] = acc_ref[2] + jnp.sum(labels_ref[...])

    # Cheap scalar epilogue; rewritten every step, final step's value wins.
    w0 = params_ref[0]
    w1 = params_ref[1]
    b = params_ref[2]
    n = params_ref[3]
    loss_ref[0, 0] = acc_ref[2] - (w0 * acc_ref[0] + w1 * acc_ref[1] + n * b)


# ----------------------------------------------------------------------------
# Jitted wrappers (padding / slicing glue fuses with the custom call).
# ----------------------------------------------------------------------------
@jax.jit
def _tensor_forward(params, x):
    batch = x.shape[0]
    tb, bp = _choose_tile(batch)
    if bp != batch:
        x = jnp.pad(x, ((0, bp - batch), (0, 0)))
    out = pl.pallas_call(
        _linear_kernel,
        out_shape=jax.ShapeDtypeStruct((bp, 1), jnp.float32),
        grid=(bp // tb,),
        in_specs=[
            pl.BlockSpec(memory_space=pltpu.SMEM),        # params (3,)
            pl.BlockSpec((tb, 2), lambda i: (i, 0)),      # x tile
        ],
        out_specs=pl.BlockSpec((tb, 1), lambda i: (i, 0)),
        compiler_params=pltpu.CompilerParams(
            dimension_semantics=("parallel",)),           # megacore on v7x
        cost_estimate=pl.CostEstimate(
            flops=4 * bp, transcendentals=0, bytes_accessed=12 * bp),
    )(params, x)
    return out[:batch]


@jax.jit
def _loss_forward(params, x, labels):
    batch = x.shape[0]
    tb, bp = _choose_tile(batch)
    if bp != batch:
        x = jnp.pad(x, ((0, bp - batch), (0, 0)))
        labels = jnp.pad(labels, ((0, bp - batch), (0, 0)))
    # [w0, w1, b, n_true] -- true batch count so zero padding stays neutral.
    params4 = jnp.concatenate(
        [params, jnp.full((1,), batch, jnp.float32)])
    loss = pl.pallas_call(
        _loss_kernel,
        out_shape=jax.ShapeDtypeStruct((1, 1), jnp.float32),
        grid=(bp // tb,),
        in_specs=[
            pl.BlockSpec(memory_space=pltpu.SMEM),        # params (4,)
            pl.BlockSpec((tb, 2), lambda i: (i, 0)),      # x tile
            pl.BlockSpec((tb, 1), lambda i: (i, 0)),      # labels tile
        ],
        out_specs=pl.BlockSpec(memory_space=pltpu.SMEM),  # scalar loss
        scratch_shapes=[pltpu.SMEM((3,), jnp.float32)],   # running sums
        compiler_params=pltpu.CompilerParams(
            dimension_semantics=("arbitrary",)),          # sequential reduction
        cost_estimate=pl.CostEstimate(
            flops=4 * bp, transcendentals=0, bytes_accessed=12 * bp),
    )(params4, x, labels)
    return loss[0, 0]


# ----------------------------------------------------------------------------
# ToyModel wrapper (mirrors the PyTorch forward signature/semantics)
# ----------------------------------------------------------------------------
class ToyModel:
    def __init__(self):
        # nn.Linear(2, 1) init: weight (1, 2), bias (1,), U(-1/sqrt(2), 1/sqrt(2)).
        kw, kb = jax.random.split(jax.random.PRNGKey(42))
        bound = 1.0 / jnp.sqrt(2.0)
        self.weight = jax.random.uniform(
            kw, (1, 2), jnp.float32, minval=-bound, maxval=bound)
        self.bias = jax.random.uniform(
            kb, (1,), jnp.float32, minval=-bound, maxval=bound)
        # Hoisted once: packed SMEM parameter vector [w0, w1, b].
        self._params = jnp.concatenate(
            [self.weight.reshape(-1), self.bias]).astype(jnp.float32)  # (3,)

    @staticmethod
    def _as_batched(x):
        # Accept pre-batched arrays directly; only stack if given a list/tuple
        # of per-sample tensors (torch.stack semantics).
        if isinstance(x, jax.Array):
            return x
        return jnp.stack(list(x))

    def forward(self, inputs, data_samples, mode='tensor'):
        x = self._as_batched(inputs).astype(jnp.float32).reshape(-1, 2)  # (B, 2)
        if mode == 'loss':
            labels = self._as_batched(data_samples).astype(jnp.float32)
            labels = labels.reshape(x.shape[0], 1)                       # (B, 1)
            loss = _loss_forward(self._params, x, labels)
            return dict(loss=loss)
        # 'tensor' and any other mode return the linear outputs; data_samples
        # are never stacked/uploaded in this path.
        return _tensor_forward(self._params, x)                          # (B, 1)

    __call__ = forward


# ----------------------------------------------------------------------------
# Pure-JAX reference for correctness check
# ----------------------------------------------------------------------------
def _ref_forward(x, labels, w, b, mode):
    out = x @ w.T + b[None, :]
    if mode == 'loss':
        return jnp.sum(labels - out)
    return out


if __name__ == "__main__":
    model = ToyModel()

    # --- small batch (B=8): list-of-samples path, all modes ------------------
    B = 8
    kx, kl = jax.random.split(jax.random.PRNGKey(0))
    x_all = jax.random.normal(kx, (B, 2), jnp.float32)
    l_all = jax.random.normal(kl, (B, 1), jnp.float32)
    inputs = [x_all[i] for i in range(B)]
    data_samples = [l_all[i] for i in range(B)]

    out_tensor = jax.block_until_ready(model(inputs, data_samples, mode='tensor'))
    ref_tensor = _ref_forward(x_all, l_all, model.weight, model.bias, 'tensor')
    assert out_tensor.shape == (B, 1)
    assert jnp.allclose(out_tensor, ref_tensor, atol=1e-5), "tensor mode mismatch"

    loss = jax.block_until_ready(model(inputs, data_samples, mode='loss')['loss'])
    ref_loss = _ref_forward(x_all, l_all, model.weight, model.bias, 'loss')
    assert jnp.allclose(loss, ref_loss, atol=1e-4), "loss mode mismatch"

    out_pred = jax.block_until_ready(model(inputs, data_samples, mode='predict'))
    assert jnp.allclose(out_pred, ref_tensor, atol=1e-5), "predict mode mismatch"

    # --- padding path (B not a multiple of 8), pre-batched fast path ---------
    B2 = 12
    kx2, kl2 = jax.random.split(jax.random.PRNGKey(1))
    x2 = jax.random.normal(kx2, (B2, 2), jnp.float32)
    l2 = jax.random.normal(kl2, (B2, 1), jnp.float32)
    out2 = jax.block_until_ready(model(x2, l2, mode='tensor'))
    assert jnp.allclose(
        out2, _ref_forward(x2, l2, model.weight, model.bias, 'tensor'),
        atol=1e-5), "padded tensor mismatch"
    loss2 = jax.block_until_ready(model(x2, l2, mode='loss')['loss'])
    assert jnp.allclose(
        loss2, _ref_forward(x2, l2, model.weight, model.bias, 'loss'),
        atol=1e-4), "padded loss mismatch"

    # --- multi-tile grid path (grid > 1: pipelined streaming + reduction) ----
    B3 = 2500
    kx3, kl3 = jax.random.split(jax.random.PRNGKey(2))
    x3 = jax.random.normal(kx3, (B3, 2), jnp.float32)
    l3 = jax.random.normal(kl3, (B3, 1), jnp.float32)
    out3 = jax.block_until_ready(model(x3, l3, mode='tensor'))
    assert jnp.allclose(
        out3, _ref_forward(x3, l3, model.weight, model.bias, 'tensor'),
        atol=1e-5), "multi-tile tensor mismatch"
    loss3 = jax.block_until_ready(model(x3, l3, mode='loss')['loss'])
    ref_loss3 = _ref_forward(x3, l3, model.weight, model.bias, 'loss')
    assert jnp.allclose(loss3, ref_loss3, atol=1e-3), "multi-tile loss mismatch"

    print("KERNEL_OK")
</pallas_src>

<mosaic_0001>
module attributes {stable_mosaic.version = 11 : i64} {
  func.func @_linear_kernel(%arg0: i32, %arg1: memref<3xf32, #tpu.memory_space<smem>>, %arg2: memref<8x2xf32, #tpu.memory_space<vmem>>, %arg3: memref<8x1xf32, #tpu.memory_space<vmem>>) attributes {dimension_semantics = [#tpu.dimension_semantics<parallel>], iteration_bounds = array<i64: 1>, scalar_prefetch = 0 : i64, scratch_operands = 0 : i64, tpu.core_type = #tpu.core_type<tc>, window_params = [{transform_indices = @transform_0, window_bounds = array<i64: 3>}, {transform_indices = @transform_1, window_bounds = array<i64: 8, 2>}, {transform_indices = @transform_2, window_bounds = array<i64: 8, 1>}]} {
    %c0 = arith.constant 0 : index
    %0 = memref.load %arg1[%c0] : memref<3xf32, #tpu.memory_space<smem>>
    %c1 = arith.constant 1 : index
    %1 = memref.load %arg1[%c1] : memref<3xf32, #tpu.memory_space<smem>>
    %c2 = arith.constant 2 : index
    %2 = memref.load %arg1[%c2] : memref<3xf32, #tpu.memory_space<smem>>
    %c0_0 = arith.constant 0 : index
    %c0_1 = arith.constant 0 : index
    %3 = vector.load %arg2[%c0_0, %c0_1] : memref<8x2xf32, #tpu.memory_space<vmem>>, vector<8x1xf32>
    %4 = vector.broadcast %0 : f32 to vector<8x1xf32>
    %5 = arith.mulf %3, %4 : vector<8x1xf32>
    %c0_2 = arith.constant 0 : index
    %c1_3 = arith.constant 1 : index
    %6 = vector.load %arg2[%c0_2, %c1_3] : memref<8x2xf32, #tpu.memory_space<vmem>>, vector<8x1xf32>
    %7 = vector.broadcast %1 : f32 to vector<8x1xf32>
    %8 = arith.mulf %6, %7 : vector<8x1xf32>
    %9 = arith.addf %5, %8 : vector<8x1xf32>
    %10 = vector.broadcast %2 : f32 to vector<8x1xf32>
    %11 = arith.addf %9, %10 : vector<8x1xf32>
    %c0_4 = arith.constant 0 : index
    %c0_5 = arith.constant 0 : index
    %12 = vector.load %arg3[%c0_4, %c0_5] : memref<8x1xf32, #tpu.memory_space<vmem>>, vector<8x1xf32>
    tpu.vector_store %arg3[%c0_4, %c0_5], %11 {strides = array<i32>} : memref<8x1xf32, #tpu.memory_space<vmem>>, vector<8x1xf32>,
    return
  }
  func.func @transform_0(%arg0: i32) -> i32 {
    %c0_i32 = arith.constant 0 : i32
    %c0_i32_0 = arith.constant 0 : i32
    return %c0_i32 : i32
  }
  func.func @transform_1(%arg0: i32) -> (i32, i32) {
    %c0_i32 = arith.constant 0 : i32
    %c0_i32_0 = arith.constant 0 : i32
    return %arg0, %c0_i32 : i32, i32
  }
  func.func @transform_2(%arg0: i32) -> (i32, i32) {
    %c0_i32 = arith.constant 0 : i32
    %c0_i32_0 = arith.constant 0 : i32
    return %arg0, %c0_i32 : i32, i32
  }
}

</mosaic_0001>

<bundles_post_ra>
// kernel: _tensor_forward.1
= control target key start
LH: loop header
LB: loop body
LE: loop exit
PB: predicated region body
PF: predicated region fallthrough
CT: control target
= control target key end

     0   :  { %7 = vsyncpa [#allocation3], 0  ;;  %s64_s12 = smov [#allocation2]   ;;  %s90_s0 = inlined_call_operand.vmem [shape: f32[3], index: 0, kind: input, shape index: {}]   ;;  %s91_s1 = inlined_call_operand.vmem [shape: f32[8,2], index: 1, kind: input, shape index: {}]   ;;  %s92_s2 = inlined_call_operand.vmem [shape: f32[8,1], index: 2, kind: output, shape index: {}]  }
   0x1   :  { %s13_s11 = sshll.u32 %s90_s0, 4  ;;  %s14_s11 = int_to_ptr.vmem [resolvable:$true] %s13_s11 }
   0x2   :  { %16 = dma.vmem_to_smem %s14_s11, 16, %s64_s12, [#allocation3]  }
   0x3   :  { %62 = dma.done.wait [#allocation3], 16  }
   0x4   :  { %63 = vsyncadd [#allocation3], 4294967280 }
   0x5   :  { %23 = sfence }
   0x6   :  { %s46_s13 = sld [smem:[#allocation2 + $0x1]]  ;;  %v27_v0 = vld [vmem:[%s91_s1] sm:$0xff]  ;;  %s65_s16 = smov 127   ;;  %vm39_vm0 = vcmask 7168  }
   0x7   :  { %s24_s17 = sld [smem:[#allocation2]] }
   0x8   :  { %s47_s18 = sld [smem:[#allocation2 + $0x2]] }
   0xc   :  { %v30_v1 = vstv %s46_s13 }
   0xd   :  { %v31_v2 = vmul.f32 %v30_v1, %v27_v0  ;;  %v28_v3 = vstv %s24_s17 }
   0xe   :  { %v29_v4 = vmul.f32 %v28_v3, %v27_v0  ;;  %v37_v6 = vstv %s47_s18 }
   0xf   :  { %33 = vrot.lane.b32.xlu0 %v31_v2, %s65_s16 }
  0x81   :  { %v34_v5 = vpop.permute.xlu0 %33 }
  0x82   :  { %v36_v7 = vadd.f32 %v34_v5, %v29_v4 }
  0x84   :  { %v38_v8 = vadd.f32 %v37_v6, %v36_v7 }
  0x86   :  { %40 = vst.msk [vmem:[%s92_s2] sm:$0xff] %vm39_vm0, %v38_v8 }
  0x87   :  { %45 = vsyncpa [#allocation3], 1 }

</bundles_post_ra>
